<compile_context>
chip_gen: v7x
topology: tpu7x:2x2x1
jax: 0.10.0
libtpu: 0.0.40
codegen_flags: <defaults>
</compile_context>

<pallas_src>
import math

import jax
import jax.numpy as jnp
from jax import lax
from jax.experimental import pallas as pl
from jax.experimental.pallas import tpu as pltpu

FEATURE_SIZE = 45
H1, H2, OUT = 16, 8, 4


def _fused_affine_kernel(wt_ref, bt_ref, x_ref, o_ref):
    # wt_ref: (OUT, F) resident, x_ref: (TB, F) streamed.
    # Contract on the feature axis -> (OUT, TB): batch lands on the lane axis,
    # so stores are dense/unmasked and the writeback DMA is lane-dense.
    acc = lax.dot_general(
        wt_ref[...], x_ref[...],
        dimension_numbers=(((1,), (1,)), ((), ())),
        preferred_element_type=jnp.float32)
    o_ref[...] = (acc + bt_ref[...]).astype(o_ref.dtype)


def fuse_params(params):
    """Fold the activation-free Linear chain into one affine map, transposed.

    Returns (w_t, b_t) with w_t: (OUT, FEATURE_SIZE), b_t: (OUT, 1).
    """
    w1, b1, w2, b2, w3, b3 = params
    w_fused = w1 @ w2 @ w3                      # (45, 4)
    b_fused = (b1 @ w2 + b2) @ w3 + b3          # (1, 4)
    return w_fused.T, b_fused.T                 # (4, 45), (4, 1)


def _round_up(x, m):
    return ((x + m - 1) // m) * m


def mlp3_forward(feat, params, *, block_rows=8192, min_pallas_rows=2048,
                 force_pallas=False, stream_bf16=False):
    """feat: (B, 45) float32 -> (B, 4) float32."""
    w_t, b_t = fuse_params(params)
    B = feat.shape[0]

    # Launch overhead dwarfs compute for tiny batches: use plain XLA there.
    if B < min_pallas_rows and not force_pallas:
        return feat @ w_t.T + b_t.T

    # Batch tile.  For the multi-step case TB must be a multiple of 128 so the
    # transposed output block's lane dim is aligned; a single full-batch block
    # (TB == B) is always legal regardless of B.
    block_rows = _round_up(block_rows, 128)
    TB = B if B <= block_rows else block_rows
    grid = (pl.cdiv(B, TB),)

    x = feat.astype(jnp.bfloat16) if stream_bf16 else feat
    w_in = w_t.astype(x.dtype)

    in_bytes = jnp.dtype(x.dtype).itemsize
    cost = pl.CostEstimate(
        flops=2 * B * FEATURE_SIZE * OUT,
        bytes_accessed=B * (FEATURE_SIZE * in_bytes + OUT * 4)
                       + (FEATURE_SIZE + 1) * OUT * 4,
        transcendentals=0)

    out_t = pl.pallas_call(
        _fused_affine_kernel,
        out_shape=jax.ShapeDtypeStruct((OUT, B), jnp.float32),
        grid=grid,
        in_specs=[
            pl.BlockSpec((OUT, FEATURE_SIZE), lambda i: (0, 0)),  # resident
            pl.BlockSpec((OUT, 1), lambda i: (0, 0)),             # resident
            pl.BlockSpec((TB, FEATURE_SIZE), lambda i: (i, 0)),   # streamed
        ],
        out_specs=pl.BlockSpec((OUT, TB), lambda i: (0, i)),      # lane-dense
        compiler_params=pltpu.CompilerParams(
            dimension_semantics=("parallel",)),
        cost_estimate=cost,
    )(w_in, b_t, x)

    # Tiny (4, B) -> (B, 4) transpose in XLA.
    return out_t.T


def init_params(key):
    """Deterministic init matching torch.nn.Linear's U(-1/sqrt(fan_in), +1/sqrt(fan_in))."""
    def linear(key, fan_in, fan_out):
        kw, kb = jax.random.split(key)
        bound = 1.0 / math.sqrt(fan_in)
        # Stored as (in, out) so the math is x @ W.
        w = jax.random.uniform(kw, (fan_in, fan_out), jnp.float32, -bound, bound)
        b = jax.random.uniform(kb, (1, fan_out), jnp.float32, -bound, bound)
        return w, b

    k1, k2, k3 = jax.random.split(key, 3)
    w1, b1 = linear(k1, FEATURE_SIZE, H1)
    w2, b2 = linear(k2, H1, H2)
    w3, b3 = linear(k3, H2, OUT)
    return (w1, b1, w2, b2, w3, b3)


def reference_forward(feat, params):
    """Unfused reference matching the PyTorch module layer-by-layer."""
    w1, b1, w2, b2, w3, b3 = params
    h = feat @ w1 + b1
    h = h @ w2 + b2
    return h @ w3 + b3


if __name__ == "__main__":
    key = jax.random.PRNGKey(0)
    k_params, k_feat = jax.random.split(key)

    params = init_params(k_params)

    # Small test batch; force the Pallas path so the kernel actually runs.
    # jit so the weight fusion (w1@w2@w3) is constant-folded out of the hot path.
    fwd = jax.jit(lambda f: mlp3_forward(f, params, force_pallas=True))
    batch = 8
    feat = jax.random.normal(k_feat, (batch, FEATURE_SIZE), dtype=jnp.float32)
    out = jax.block_until_ready(fwd(feat))
    ref = reference_forward(feat, params)
    assert out.shape == (batch, OUT)
    assert jnp.allclose(out, ref, atol=1e-5, rtol=1e-5)

    # Ragged multi-step grid check: 300 rows with 128-row tiles -> grid=(3,),
    # last block partial (no host-side padding, Pallas masks the ragged block).
    fwd2 = jax.jit(lambda f: mlp3_forward(f, params, block_rows=128,
                                          force_pallas=True))
    feat2 = jax.random.normal(jax.random.PRNGKey(1), (300, FEATURE_SIZE),
                              dtype=jnp.float32)
    out2 = jax.block_until_ready(fwd2(feat2))
    ref2 = reference_forward(feat2, params)
    assert out2.shape == (300, OUT)
    assert jnp.allclose(out2, ref2, atol=1e-5, rtol=1e-5)

    print("KERNEL_OK")
</pallas_src>

<mosaic_0001>
module attributes {stable_mosaic.version = 11 : i64} {
  func.func @_fused_affine_kernel(%arg0: i32, %arg1: memref<4x45xf32, #tpu.memory_space<vmem>>, %arg2: memref<4x1xf32, #tpu.memory_space<vmem>>, %arg3: memref<8x45xf32, #tpu.memory_space<vmem>>, %arg4: memref<4x8xf32, #tpu.memory_space<vmem>>) attributes {dimension_semantics = [#tpu.dimension_semantics<parallel>], iteration_bounds = array<i64: 1>, scalar_prefetch = 0 : i64, scratch_operands = 0 : i64, tpu.core_type = #tpu.core_type<tc>, window_params = [{pipeline_mode = #tpu.pipeline_mode<synchronous>, transform_indices = @transform_0, window_bounds = array<i64: 4, 45>}, {pipeline_mode = #tpu.pipeline_mode<synchronous>, transform_indices = @transform_1, window_bounds = array<i64: 4, 1>}, {transform_indices = @transform_2, window_bounds = array<i64: 8, 45>}, {transform_indices = @transform_3, window_bounds = array<i64: 4, 8>}]} {
    %c0 = arith.constant 0 : index
    %c0_0 = arith.constant 0 : index
    %0 = vector.load %arg1[%c0, %c0_0] : memref<4x45xf32, #tpu.memory_space<vmem>>, vector<4x45xf32>
    %c0_1 = arith.constant 0 : index
    %c0_2 = arith.constant 0 : index
    %1 = vector.load %arg3[%c0_1, %c0_2] : memref<8x45xf32, #tpu.memory_space<vmem>>, vector<8x45xf32>
    %cst = arith.constant dense<0.000000e+00> : vector<4x8xf32>
    %2 = tpu.matmul %0, %1, %cst {dimension_numbers = #tpu.dot_dimension_numbers<[1], [1], [0], [0], [0, 0, 1, 0], [], []>} : vector<4x45xf32>, vector<8x45xf32>, vector<4x8xf32> -> vector<4x8xf32>
    %c0_3 = arith.constant 0 : index
    %c0_4 = arith.constant 0 : index
    %3 = vector.load %arg2[%c0_3, %c0_4] : memref<4x1xf32, #tpu.memory_space<vmem>>, vector<4x1xf32>
    %4 = vector.broadcast %3 : vector<4x1xf32> to vector<4x8xf32>
    %5 = arith.addf %2, %4 : vector<4x8xf32>
    %c0_5 = arith.constant 0 : index
    %c0_6 = arith.constant 0 : index
    %6 = vector.load %arg4[%c0_5, %c0_6] : memref<4x8xf32, #tpu.memory_space<vmem>>, vector<4x8xf32>
    tpu.vector_store %arg4[%c0_5, %c0_6], %5 {strides = array<i32>} : memref<4x8xf32, #tpu.memory_space<vmem>>, vector<4x8xf32>,
    return
  }
  func.func @transform_0(%arg0: i32) -> (i32, i32) {
    %c0_i32 = arith.constant 0 : i32
    %c0_i32_0 = arith.constant 0 : i32
    %c0_i32_1 = arith.constant 0 : i32
    return %c0_i32, %c0_i32_0 : i32, i32
  }
  func.func @transform_1(%arg0: i32) -> (i32, i32) {
    %c0_i32 = arith.constant 0 : i32
    %c0_i32_0 = arith.constant 0 : i32
    %c0_i32_1 = arith.constant 0 : i32
    return %c0_i32, %c0_i32_0 : i32, i32
  }
  func.func @transform_2(%arg0: i32) -> (i32, i32) {
    %c0_i32 = arith.constant 0 : i32
    %c0_i32_0 = arith.constant 0 : i32
    return %arg0, %c0_i32 : i32, i32
  }
  func.func @transform_3(%arg0: i32) -> (i32, i32) {
    %c0_i32 = arith.constant 0 : i32
    %c0_i32_0 = arith.constant 0 : i32
    return %c0_i32, %arg0 : i32, i32
  }
}

</mosaic_0001>

<bundles_post_ra>
// kernel: _lambda_.1
= control target key start
LH: loop header
LB: loop body
LE: loop exit
PB: predicated region body
PF: predicated region fallthrough
CT: control target
= control target key end

     0   :  { %8 = vsyncpa [#allocation3], 0  ;;  %s295_s0 = inlined_call_operand.hbm [shape: f32[4,45], index: 0, kind: input, shape index: {}]   ;;  %s296_s1 = inlined_call_operand.vmem [shape: f32[4,1], index: 1, kind: input, shape index: {}]   ;;  %s297_s2 = inlined_call_operand.hbm [shape: f32[8,45], index: 2, kind: input, shape index: {}]   ;;  %s298_s3 = inlined_call_operand.hbm [shape: f32[4,8], index: 3, kind: output, shape index: {}]  }
   0x1   :  { %9 = vsyncpa [#allocation6], 0 }
   0x2   :  { %10 = vsyncpa [#allocation4], 0  ;;  %s230_s12 = smov [#allocation2]   ;;  %s231_s14 = smov [#allocation5]  }
   0x3   :  { %s17_s13 = sshll.u32 %s230_s12, 4  ;;  %s29_s15 = sshll.u32 %s231_s14, 4  ;;  %s18_s13 = int_to_ptr.vmem [resolvable:$true] %s17_s13  ;;  %s30_s15 = int_to_ptr.vmem [resolvable:$true] %s29_s15 }
   0x4   :  { %s158_s18 = scalar_lea.hbm %s295_s0, 64 }
   0x5   :  { %p159_p0 = scmp.ne.s32.totalorder %s295_s0, %s158_s18  ;;  %p162_p1 = scmp.lt.u32.totalorder %s158_s18, %s295_s0 }
   0x7   :  { %p164_p2 = pnand %p162_p1, %p159_p0 }
   0x9   :  { %167 = shalt.err (!%p164_p2)
}
   0xa   :  { %s168_s23 = scalar_lea.vmem %s18_s13, 64  ;;  %p173_p4 = scmp.lt.s32.totalorder %s18_s13, %s18_s13 }
   0xb   :  { %p169_p3 = scmp.ne.s32.totalorder %s18_s13, %s168_s23  ;;  %p174_p5 = scmp.lt.s32.totalorder %s168_s23, %s168_s23 }
   0xd   :  { %p175_p6 = por %p174_p5, %p173_p4 }
   0xf   :  { %p176_p7 = pnand %p175_p6, %p169_p3 }
  0x11   :  { %179 = shalt.err (!%p176_p7)
}
  0x12   :  { %20 = dma.hbm_to_vmem [thread:$0]  %s295_s0, 64, %s18_s13, [#allocation3]  }
  0x13   :  { %s180_s28 = scalar_lea.hbm %s297_s2, 128 }
  0x14   :  { %p181_p8 = scmp.ne.s32.totalorder %s297_s2, %s180_s28  ;;  %p184_p9 = scmp.lt.u32.totalorder %s180_s28, %s297_s2 }
  0x16   :  { %p186_p10 = pnand %p184_p9, %p181_p8 }
  0x18   :  { %189 = shalt.err (!%p186_p10)
}
  0x19   :  { %s190_s6 = scalar_lea.vmem %s30_s15, 128  ;;  %p195_p12 = scmp.lt.s32.totalorder %s30_s15, %s30_s15 }
  0x1a   :  { %p191_p11 = scmp.ne.s32.totalorder %s30_s15, %s190_s6  ;;  %p196_p13 = scmp.lt.s32.totalorder %s190_s6, %s190_s6 }
  0x1c   :  { %p197_p0 = por %p196_p13, %p195_p12 }
  0x1e   :  { %p198_p1 = pnand %p197_p0, %p191_p11 }
  0x20   :  { %201 = shalt.err (!%p198_p1)
}
  0x21   :  { %32 = dma.hbm_to_vmem [thread:$0]  %s297_s2, 128, %s30_s15, [#allocation6]  }
  0x22   :  { %224 = dma.done.wait [#allocation3], 64  }
  0x23   :  { %225 = vsyncadd [#allocation3], 4294967232 }
  0x24   :  { %226 = dma.done.wait [#allocation6], 128  }
  0x25   :  { %227 = vsyncadd [#allocation6], 4294967168  ;;  %v232_v0 = vmov 0.0   ;;  %vm233_vm0 = vmmov 0   ;;  %v234_v1 = vmov 0   ;;  %vm47_vm1 = vcmask 367616  }
  0x26   :  { %146 = vmatprep.subr.mxu0 %v232_v0  ;;  %148 = vmatprep.mubr.msk.f32.mxu0 %vm233_vm0, %v232_v0  ;;  %v40_v2 = vld [vmem:[#allocation5] sm:$0xff]  ;;  %v41_v3 = vld [vmem:[%s296_s1] sm:$0xf]  ;;  %s235_s2 = smov [#allocation7]   ;;  %vm124_vm2 = vcmask 60416  }
  0x27   :  { %157 = vset.pattern.permute.xlu0 %v234_v1  ;;  %147 = vmatpush3.xpose.msk.msra.mxu0 %vm47_vm1, %v40_v2  ;;  %v39_v4 = vld [vmem:[#allocation2] sm:$0xf]  ;;  %s132_s10 = sshll.u32 %s235_s2, 4  ;;  %s133_s10 = int_to_ptr.vmem [resolvable:$true] %s132_s10 }
  0x28   :  { %44 = vperm.xlu0 %157, %v41_v3   ;;  %s202_s11 = scalar_lea.vmem %s133_s10, 64  ;;  %p207_p3 = scmp.lt.s32.totalorder %s133_s10, %s133_s10 }
  0x29   :  { %p203_p2 = scmp.ne.s32.totalorder %s133_s10, %s202_s11  ;;  %p208_p4 = scmp.lt.s32.totalorder %s202_s11, %s202_s11 }
  0x2a   :  { %149 = vmatmul.mubr.msk.f32.vlgmr.msra.gmra.mrb[0].mxu0 %vm47_vm1, %v39_v4 }
  0x2b   :  { %p209_p5 = por %p208_p4, %p207_p3 }
  0x2d   :  { %p210_p6 = pnand %p209_p5, %p203_p2 }
  0xa7   :  { %v45_v5 = vpop.permute.xlu0 %44 }
  0xfd   :  { %v120_v6 = vpop.f32.mrb[0].mxu0 }
  0xfe   :  { %v121_v7 = vadd.f32 %v120_v6, %v45_v5  ;;  %v150_v8 = vpop.f32.mrb[1].mxu0 }
 0x100   :  { %125 = vst.msk [vmem:[#allocation7] sm:$0xf] %vm124_vm2, %v121_v7 }
 0x101   :  { %213 = shalt.err (!%p210_p6)
}
 0x102   :  { %s214_s13 = scalar_lea.hbm %s298_s3, 64 }
 0x103   :  { %p215_p7 = scmp.ne.s32.totalorder %s298_s3, %s214_s13  ;;  %p218_p8 = scmp.lt.u32.totalorder %s214_s13, %s298_s3 }
 0x105   :  { %p220_p9 = pnand %p218_p8, %p215_p7 }
 0x107   :  { %223 = shalt.err (!%p220_p9)
}
 0x108   :  { %135 = dma.vmem_to_hbm [thread:$0]  %s133_s10, 64, %s298_s3, [#allocation4]  }
 0x109   :  { %228 = dma.done.wait [#allocation4], 64  }
 0x10a   :  { %229 = vsyncadd [#allocation4], 4294967232 }
 0x10b   :  { %139 = vsyncpa [#allocation3], 1 }
 0x10c   :  { %140 = vsyncpa [#allocation6], 1 }
 0x10d   :  { %141 = vsyncpa [#allocation4], 1 }

</bundles_post_ra>
